<compile_context>
chip_gen: v6e
topology: v6e:2x2x1
jax: 0.10.0
libtpu: 0.0.40
codegen_flags: <defaults>
</compile_context>

<pallas_src>
import functools

import jax
import jax.numpy as jnp
from jax.experimental import pallas as pl
from jax.experimental.pallas import tpu as pltpu


# ----------------------------------------------------------------------------- helpers
def _round_up(x, m):
    return ((x + m - 1) // m) * m


def _vmem_limit_bytes():
    try:
        cap = int(pltpu.get_tpu_info().vmem_capacity_bytes)
    except Exception:
        cap = 64 * 1024 * 1024  # conservative (v7x-sized) fallback
    return min(cap * 3 // 4, 100 * 1024 * 1024)


# ----------------------------------------------------------------------------- kernels
def _conv_matmul_kernel(x_ref, w_ref, b_ref, o_ref, acc_ref):
    """Pre-gathered (im2col) path: one MXU matmul per output tile.

    x_ref: (1, K*Cin, L_tile) bf16     w_ref: (Cout, K*Cin) bf16
    b_ref: (Cout, 1) f32               o_ref: (1, Cout, L_tile)
    acc_ref: (Cout, L_tile) f32 VMEM scratch
    """
    acc_ref[...] = jnp.dot(w_ref[...], x_ref[0], preferred_element_type=jnp.float32)
    o_ref[0] = (acc_ref[...] + b_ref[...]).astype(o_ref.dtype)


def _conv_taps_kernel(xa_ref, xb_ref, w_ref, b_ref, o_ref, xwin_ref, acc_ref,
                      *, taps, cin, dilation, l_tile):
    """Large-Cin, stride-1 path: K tap matmuls against a halo'd VMEM window.

    xa_ref: (1, Cin, L_tile)  input tile j
    xb_ref: (1, Cin, 128)     first 128 columns of tile j+1 (halo source)
    w_ref:  (Cout, K*Cin)     flattened weights (tap-major)
    b_ref:  (Cout, 1) f32
    o_ref:  (1, Cout, L_tile)
    xwin_ref: (Cin, L_tile + 128) bf16 scratch   acc_ref: (Cout, L_tile) f32 scratch
    """
    # Assemble [ tile j | halo ] once; both stores are 128-lane aligned.
    xwin_ref[:, :l_tile] = xa_ref[0]
    xwin_ref[:, l_tile:] = xb_ref[0]

    acc_ref[...] = jnp.dot(w_ref[:, :cin], xwin_ref[:, :l_tile],
                           preferred_element_type=jnp.float32)
    for k in range(1, taps):              # K is small & static -> unrolled
        sh = k * dilation                 # static lane shift, <= 128 by construction
        acc_ref[...] += jnp.dot(w_ref[:, k * cin:(k + 1) * cin],
                                xwin_ref[:, sh:sh + l_tile],
                                preferred_element_type=jnp.float32)
    o_ref[0] = (acc_ref[...] + b_ref[...]).astype(o_ref.dtype)


# ----------------------------------------------------------------------------- wrapper
def conv_norm_forward(signal, weight, bias=None, *, stride=1, padding=None,
                      dilation=1, compute_dtype=jnp.bfloat16, l_tile_max=1024):
    """Pallas implementation of ConvNorm.forward (Conv1d, cross-correlation).

    signal: (B, Cin, L)      weight: (Cout, Cin, K)      bias: (Cout,) or None
    """
    B, Cin, L = signal.shape
    Cout, Cin_w, K = weight.shape
    assert Cin == Cin_w
    if padding is None:
        assert K % 2 == 1
        padding = int(dilation * (K - 1) / 2)
    Lout = (L + 2 * padding - dilation * (K - 1) - 1) // stride + 1
    assert Lout > 0
    out_dtype = signal.dtype
    halo = (K - 1) * dilation

    # Small-channel / strided / huge-halo configs: im2col in XLA (input is small or
    # decimated there) so the kernel sees a single full-width MXU contraction.
    use_pregather = (stride != 1) or (Cin < 128) or (halo > 128)

    # ---- pick a lane-dense L tile that keeps the working set well inside VMEM -------
    l_tile_max = max(128, (int(l_tile_max) // 128) * 128)
    l_tile = min(l_tile_max, _round_up(Lout, 128))
    in_bytes = jnp.dtype(compute_dtype).itemsize
    out_bytes = jnp.dtype(out_dtype).itemsize
    cin_tile = K * Cin if use_pregather else Cin

    def _tile_bytes(lt):
        return (Cout * lt * 4                      # f32 accumulator scratch
                + 2 * Cout * lt * out_bytes        # double-buffered output tile
                + 2 * cin_tile * lt * in_bytes     # double-buffered input tile
                + (0 if use_pregather else cin_tile * (lt + 128) * in_bytes))

    vmem_limit = _vmem_limit_bytes()
    while l_tile > 128 and _tile_bytes(l_tile) > vmem_limit // 2:
        l_tile -= 128

    Lout_pad = _round_up(Lout, l_tile)
    nL = Lout_pad // l_tile

    # ---- prepare operands (bf16 MXU inputs, f32 bias) --------------------------------
    x = signal.astype(compute_dtype)
    w_flat = jnp.transpose(weight, (0, 2, 1)).reshape(Cout, K * Cin).astype(compute_dtype)
    if bias is None:
        b_col = jnp.zeros((Cout, 1), jnp.float32)
    else:
        b_col = bias.astype(jnp.float32).reshape(Cout, 1)

    if use_pregather:
        # im2col: x_in[b, k*Cin + c, l] = x_padded[b, c, l*stride + k*dilation]
        span = (Lout_pad - 1) * stride + 1
        need = span + halo
        x_pad = jnp.pad(x, ((0, 0), (0, 0), (padding, max(0, need - L - padding))))
        cols = [x_pad[:, :, k * dilation:k * dilation + span:stride] for k in range(K)]
        x_in = jnp.concatenate(cols, axis=1)                      # (B, K*Cin, Lout_pad)
        in_specs = [
            pl.BlockSpec((1, K * Cin, l_tile), lambda b, j: (b, 0, j)),
            pl.BlockSpec((Cout, K * Cin), lambda b, j: (0, 0)),   # resident weights
            pl.BlockSpec((Cout, 1), lambda b, j: (0, 0)),
        ]
        scratch = [pltpu.VMEM((Cout, l_tile), jnp.float32)]
        kernel = _conv_matmul_kernel
        args = (x_in, w_flat, b_col)
    else:
        # Input tiled like the output; one extra 128-wide block holds the halo.
        lin_total = Lout_pad + 128
        x_in = jnp.pad(x, ((0, 0), (0, 0), (padding, lin_total - L - padding)))
        blocks_per_tile = l_tile // 128
        in_specs = [
            pl.BlockSpec((1, Cin, l_tile), lambda b, j: (b, 0, j)),
            pl.BlockSpec((1, Cin, 128),
                         lambda b, j: (b, 0, (j + 1) * blocks_per_tile)),
            pl.BlockSpec((Cout, K * Cin), lambda b, j: (0, 0)),   # resident weights
            pl.BlockSpec((Cout, 1), lambda b, j: (0, 0)),
        ]
        scratch = [pltpu.VMEM((Cin, l_tile + 128), compute_dtype),
                   pltpu.VMEM((Cout, l_tile), jnp.float32)]
        kernel = functools.partial(_conv_taps_kernel, taps=K, cin=Cin,
                                   dilation=dilation, l_tile=l_tile)
        args = (x_in, x_in, w_flat, b_col)

    out = pl.pallas_call(
        kernel,
        out_shape=jax.ShapeDtypeStruct((B, Cout, Lout_pad), out_dtype),
        grid_spec=pltpu.PrefetchScalarGridSpec(
            num_scalar_prefetch=0,
            grid=(B, nL),
            in_specs=in_specs,
            out_specs=pl.BlockSpec((1, Cout, l_tile), lambda b, j: (b, 0, j)),
            scratch_shapes=scratch,
        ),
        compiler_params=pltpu.CompilerParams(
            dimension_semantics=("parallel", "parallel"),
            vmem_limit_bytes=int(vmem_limit),
        ),
    )(*args)

    if Lout_pad != Lout:
        out = out[:, :, :Lout]
    return out


# ----------------------------------------------------------------------------- init + test
def init_conv_norm_params(key, in_channels, out_channels, kernel_size,
                          w_init_gain="linear"):
    """xavier_uniform weight (gain('linear')==1) + PyTorch-default bias init."""
    kw, kb = jax.random.split(key)
    gain = 1.0
    fan_in = in_channels * kernel_size
    fan_out = out_channels * kernel_size
    bound_w = gain * jnp.sqrt(6.0 / (fan_in + fan_out))
    weight = jax.random.uniform(
        kw, (out_channels, in_channels, kernel_size),
        minval=-bound_w, maxval=bound_w, dtype=jnp.float32)
    bound_b = 1.0 / jnp.sqrt(fan_in)
    bias = jax.random.uniform(
        kb, (out_channels,), minval=-bound_b, maxval=bound_b, dtype=jnp.float32)
    return weight, bias


def _conv_reference(x, w, b, stride, padding, dilation):
    y = jax.lax.conv_general_dilated(
        x, w, window_strides=(stride,), padding=[(padding, padding)],
        rhs_dilation=(dilation,), dimension_numbers=("NCH", "OIH", "NCH"),
        precision=jax.lax.Precision.HIGHEST)
    return y + b.reshape(1, -1, 1)


def _check(name, x, w, b, *, stride=1, padding=None, dilation=1):
    out = conv_norm_forward(x, w, b, stride=stride, padding=padding, dilation=dilation)
    out = jax.block_until_ready(out)
    K = w.shape[2]
    pad = padding if padding is not None else dilation * (K - 1) // 2
    # Reference on bf16-rounded inputs: the kernel feeds bf16 to the MXU (f32 accum),
    # so remaining differences are only accumulation-order noise.
    xq = x.astype(jnp.bfloat16).astype(jnp.float32)
    wq = w.astype(jnp.bfloat16).astype(jnp.float32)
    ref = _conv_reference(xq, wq, b, stride, pad, dilation)
    assert out.shape == ref.shape, (name, out.shape, ref.shape)
    err = float(jnp.max(jnp.abs(out - ref)))
    assert err < 2e-3, (name, err)


if __name__ == "__main__":
    key = jax.random.PRNGKey(0)

    # 1) Small shapes consistent with ConvNorm: B=2, Cin=4, Cout=8, K=3, L=16 ("same" pad).
    k1, k2, k3, _ = jax.random.split(key, 4)
    x1 = jax.random.normal(k1, (2, 4, 16), dtype=jnp.float32)
    w1, b1 = init_conv_norm_params(k2, 4, 8, 3)
    _check("small_same", x1, w1, b1)

    # 2) Strided + dilated variant (exercises the wrapper-hoisted stride path).
    _check("strided_dilated", x1, w1, b1, stride=2, dilation=2)

    # 3) Wide-channel variant (exercises the L-tiled halo path, nL=2 tiles).
    x3 = jax.random.normal(k3, (1, 128, 1200), dtype=jnp.float32)
    w3, b3 = init_conv_norm_params(k2, 128, 32, 5)
    _check("wide_channels", x3, w3, b3)

    print("KERNEL_OK")
</pallas_src>

<mosaic_0001>
module attributes {stable_mosaic.version = 11 : i64} {
  func.func @_conv_matmul_kernel(%arg0: i32, %arg1: i32, %arg2: memref<1x12x128xbf16, #tpu.memory_space<vmem>>, %arg3: memref<8x12xbf16, #tpu.memory_space<vmem>>, %arg4: memref<8x1xf32, #tpu.memory_space<vmem>>, %arg5: memref<1x8x128xf32, #tpu.memory_space<vmem>>, %arg6: memref<8x128xf32, #tpu.memory_space<vmem>>) attributes {dimension_semantics = [#tpu.dimension_semantics<parallel>, #tpu.dimension_semantics<parallel>], iteration_bounds = array<i64: 2, 1>, scalar_prefetch = 0 : i64, scratch_operands = 1 : i64, tpu.core_type = #tpu.core_type<tc>, window_params = [{transform_indices = @transform_0, window_bounds = array<i64: 1, 12, 128>}, {pipeline_mode = #tpu.pipeline_mode<synchronous>, transform_indices = @transform_1, window_bounds = array<i64: 8, 12>}, {pipeline_mode = #tpu.pipeline_mode<synchronous>, transform_indices = @transform_2, window_bounds = array<i64: 8, 1>}, {transform_indices = @transform_3, window_bounds = array<i64: 1, 8, 128>}]} {
    %c0 = arith.constant 0 : index
    %c0_0 = arith.constant 0 : index
    %0 = vector.load %arg3[%c0, %c0_0] : memref<8x12xbf16, #tpu.memory_space<vmem>>, vector<8x12xbf16>
    %c0_1 = arith.constant 0 : index
    %c0_2 = arith.constant 0 : index
    %c0_3 = arith.constant 0 : index
    %1 = vector.load %arg2[%c0_1, %c0_2, %c0_3] : memref<1x12x128xbf16, #tpu.memory_space<vmem>>, vector<1x12x128xbf16>
    %2 = vector.shape_cast %1 : vector<1x12x128xbf16> to vector<12x128xbf16>
    %cst = arith.constant dense<0.000000e+00> : vector<8x128xf32>
    %3 = tpu.matmul %0, %2, %cst {dimension_numbers = #tpu.dot_dimension_numbers<[1], [0], [0], [1], [0, 0, 1, 1], [], []>} : vector<8x12xbf16>, vector<12x128xbf16>, vector<8x128xf32> -> vector<8x128xf32>
    %c0_4 = arith.constant 0 : index
    %c0_5 = arith.constant 0 : index
    %4 = vector.load %arg6[%c0_4, %c0_5] : memref<8x128xf32, #tpu.memory_space<vmem>>, vector<8x128xf32>
    tpu.vector_store %arg6[%c0_4, %c0_5], %3 {strides = array<i32>} : memref<8x128xf32, #tpu.memory_space<vmem>>, vector<8x128xf32>,
    %c0_6 = arith.constant 0 : index
    %c0_7 = arith.constant 0 : index
    %5 = vector.load %arg6[%c0_6, %c0_7] : memref<8x128xf32, #tpu.memory_space<vmem>>, vector<8x128xf32>
    %c0_8 = arith.constant 0 : index
    %c0_9 = arith.constant 0 : index
    %6 = vector.load %arg4[%c0_8, %c0_9] : memref<8x1xf32, #tpu.memory_space<vmem>>, vector<8x1xf32>
    %7 = vector.broadcast %6 : vector<8x1xf32> to vector<8x128xf32>
    %8 = arith.addf %5, %7 : vector<8x128xf32>
    %c0_10 = arith.constant 0 : index
    %c0_11 = arith.constant 0 : index
    %c0_12 = arith.constant 0 : index
    %9 = vector.load %arg5[%c0_10, %c0_11, %c0_12] : memref<1x8x128xf32, #tpu.memory_space<vmem>>, vector<1x8x128xf32>
    %10 = vector.shape_cast %9 : vector<1x8x128xf32> to vector<8x128xf32>
    %11 = vector.shape_cast %8 : vector<8x128xf32> to vector<1x8x128xf32>
    tpu.vector_store %arg5[%c0_10, %c0_11, %c0_12], %11 {strides = array<i32>} : memref<1x8x128xf32, #tpu.memory_space<vmem>>, vector<1x8x128xf32>,
    return
  }
  func.func @transform_0(%arg0: i32, %arg1: i32) -> (i32, i32, i32) {
    %c0_i32 = arith.constant 0 : i32
    %c0_i32_0 = arith.constant 0 : i32
    return %arg0, %c0_i32, %arg1 : i32, i32, i32
  }
  func.func @transform_1(%arg0: i32, %arg1: i32) -> (i32, i32) {
    %c0_i32 = arith.constant 0 : i32
    %c0_i32_0 = arith.constant 0 : i32
    %c0_i32_1 = arith.constant 0 : i32
    return %c0_i32, %c0_i32_0 : i32, i32
  }
  func.func @transform_2(%arg0: i32, %arg1: i32) -> (i32, i32) {
    %c0_i32 = arith.constant 0 : i32
    %c0_i32_0 = arith.constant 0 : i32
    %c0_i32_1 = arith.constant 0 : i32
    return %c0_i32, %c0_i32_0 : i32, i32
  }
  func.func @transform_3(%arg0: i32, %arg1: i32) -> (i32, i32, i32) {
    %c0_i32 = arith.constant 0 : i32
    %c0_i32_0 = arith.constant 0 : i32
    return %arg0, %c0_i32, %arg1 : i32, i32, i32
  }
}

</mosaic_0001>

<bundles_post_ra>
// kernel: tpu_custom_call.1
= control target key start
LH: loop header
LB: loop body
LE: loop exit
PB: predicated region body
PF: predicated region fallthrough
CT: control target
= control target key end

     0   :  { %8 = vsyncpa [#allocation4], 0  ;;  %s652_s0 = inlined_call_operand.vmem [shape: bf16[2,12,128], index: 0, kind: input, shape index: {}]   ;;  %s653_s1 = inlined_call_operand.vmem [shape: bf16[8,12], index: 1, kind: input, shape index: {}]   ;;  %s654_s2 = inlined_call_operand.vmem [shape: f32[8,1], index: 2, kind: input, shape index: {}]   ;;  %s655_s3 = inlined_call_operand.hbm [shape: f32[2,8,128], index: 3, kind: output, shape index: {}]  }
   0x1   :  { %10 = vsyncpa [#allocation4 + $0x1], 0  ;;  %s535_s12 = smov 0   ;;  %s537_s13 = smov 0  }
   0x2   :  { %s539_s14 = smov 0   ;;  %s541_s15 = smov 0  }
   0x3   :  { %s543_s16 = smov 0   ;;  %s545_s17 = smov 0  }
   0x4 LB: > { %s350_s18 = sadd.s32 4294967295, %s509_s17   ;;  %s351_s19 = sadd.s32 4294967294, %s509_s17   ;;  %s509_s17 = sphi %s545_s17, %s16_s17   ;;  %s505_s16 = sphi %s543_s16, %s662_s16   ;;  %s501_s15 = sphi %s541_s15, %s661_s15   ;;  %s497_s14 = sphi %s539_s14, %s660_s14   ;;  %s493_s13 = sphi %s537_s13, %s659_s13   ;;  %s489_s12 = sphi %s535_s12, %s658_s12  }
   0x5   : > { %s28_s20 = sadd.s32 1, %s505_s16  ;;  %s107_s21 = sadd.s32 1, %s497_s14 }
   0x6   : > { %p30_p0 = scmp.ge.s32.totalorder %s28_s20, 2  ;;  %p117_p1 = scmp.ne.s32.totalorder %s497_s14, %s493_s13 }
   0x7   : > { %p118_p2 = scmp.eq.s32.totalorder %s350_s18, 1  ;;  %p123_p3 = scmp.ne.s32.totalorder %s493_s13, %s489_s12 }
   0x8   : > { %s664_s20 = smov (%p30_p0, %s28_s20), 0  ;;  %p124_p5 = scmp.eq.s32.totalorder %s351_s19, 1 }
   0x9   : > { %p575_p4 = por %p118_p2, %p117_p1  ;;  %s102_s23 = ssub.s32 %s505_s16, %s664_s20 }
   0xa   : > { %p354_p6 = scmp.ge.s32.totalorder %s509_s17, 1  ;;  %p105_p7 = scmp.eq.s32.totalorder %s102_s23, 0 }
   0xb   : > { %p582_p8 = por %p124_p5, %p123_p3  ;;  %p159_p9 = scmp.lt.s32.totalorder %s509_s17, 3 }
   0xc   : > { %s588_s25 = scalar_select %p105_p7, %s497_s14, %s107_s21  }
   0xd   : > { %p160_p10 = pnand %p354_p6, %p159_p9 }
   0xe   : > { %p186_p11 = scmp.lt.s32.totalorder (!%p160_p10), %s501_s15, 1  ;;  %s183_s8 = sand.u32 (!%p160_p10), 1, %s493_s13  }
   0xf   : > { %163 = sbr.rel (%p160_p10) target bundleno = 238 (0xee), region = 32  ;;  %s355_s9 = sshll.u32 (!%p160_p10), %s183_s8, 3 }
  0x10   : > { %s361_s10 = sshll.u32 (!%p160_p10), %s501_s15, 7  ;;  %s185_s11 = scalar_lea.vmem (!%p160_p10), [#allocation3], %s355_s9 }
  0x11   : > { %s276_s18 = sshll.u32 (!%p160_p10), %s185_s11, 4  ;;  %s606_s23 = scalar_lea.hbm (!%p160_p10), %s655_s3, %s361_s10  ;;  %s608_s18 = int_to_ptr.vmem [resolvable:$true] %s276_s18 }
  0x12   : > { %s262_s26 = scalar_lea.sflag (!%p160_p10), [#allocation4], %s183_s8  ;;  %s433_s27 = scalar_lea.vmem (!%p160_p10), %s608_s18, 128 }
  0x13   : > { %p434_p12 = scmp.ne.s32.totalorder (!%p160_p10), %s608_s18, %s433_s27 }
  0x14   : > { %v511_v0 = vmov 0.0   ;;  %vm512_vm0 = vmmov 0   ;;  %v253_v1 = vld [vmem:[%s654_s2] sm:$0xff]  ;;  %s187_s28 = scalar_select %p186_p11, %s501_s15, 1  ;;  %v513_v2 = vmov 0   ;;  %vm207_vm1 = vcmask 1045504  }
  0x15   : > { %367 = vmatprep.subr.bf16.mxu0 %v511_v0  ;;  %369 = vmatprep.mubr.msk.bf16.mxu0 %vm512_vm0, %v511_v0  ;;  %v195_v5 = vld [vmem:[%s653_s1] sm:$0xf]  ;;  %vm203_vm2 = vcmask 97280   ;;  %p435_p13 = pnand %p434_p12, %p575_p4  ;;  %s514_s15 = smov [#allocation3]  }
  0x16   : > { %431 = vset.pattern.permute.xlu0 %v513_v2  ;;  %s364_s29 = sshll.u32 %s187_s28, 3  ;;  %s437_s28 = sshll.u32 %s514_s15, 4  ;;  %s438_s28 = int_to_ptr.vmem [resolvable:$false] %s437_s28 }
  0x17   : > { %256 = vperm.xlu0 %431, %v253_v1   ;;  %s193_s5 = scalar_lea.vmem %s652_s0, %s364_s29  ;;  %p436_p0 = pneg %p435_p13 }
  0x18   : > { %v432_v3 = vld [vmem:[%s193_s5] sm:$0x3f]   ;;  %s439_s29 = scalar_lea.vmem %s438_s28, 256  ;;  %p440_p1 = scmp.lt.s32.totalorder %s608_s18, %s438_s28 }
  0x19   : > { %v209_v4 = vsel %vm207_vm1, %v432_v3, 0  ;;  %p441_p2 = scmp.lt.s32.totalorder %s439_s29, %s433_s27 }
  0x1a   : > { %368 = vmatpush3.bf16.msra.mxu0 %v209_v4 }
  0x1b   : > { %p442_p3 = por %p441_p2, %p440_p1 }
  0x1d   : > { %370 = vmatmul.mubr.msk.bf16.vlgmr.msra.gmra.mxu0 %vm203_vm2, %v195_v5  ;;  %p443_p5 = pnand %p442_p3, %p436_p0 }
  0x92   : > { %v257_v6 = vpop.permute.xlu0 %256 }
  0xdd   : > { %v245_v7 = vpop.f32.mrf.mxu0 }
  0xde   : > { %v259_v8 = vadd.f32 %v257_v6, %v245_v7 }
  0xdf   : > { %v371_v9 = vpop.f32.mrf.mxu0 }
  0xe0   : > { %260 = vst [vmem:[%s185_s11] sm:$0xff] %v259_v8 }
  0xe1   : > { %v248_v10 = vpop.f32.mrf.mxu0 }
  0xe2   : > { %446 = shalt.err (!%p443_p5)
}
  0xe3   : > { %s447_s30 = scalar_lea.hbm %s606_s23, 128  ;;  %s451_s6 = scalar_lea.hbm %s655_s3, 256 }
  0xe4   : > { %p448_p6 = scmp.ne.s32.totalorder %s606_s23, %s447_s30  ;;  %p452_p10 = scmp.lt.s32.totalorder %s606_s23, %s655_s3 }
  0xe5   : > { %p453_p11 = scmp.lt.s32.totalorder %s451_s6, %s447_s30 }
  0xe6   : > { %p449_p7 = pnand %p448_p6, %p575_p4 }
  0xe7   : > { %p454_p12 = por %p453_p11, %p452_p10 }
  0xe8   : > { %p450_p9 = pneg %p449_p7 }
  0xea   : > { %p455_p13 = pnand %p454_p12, %p450_p9 }
  0xec   : > { %458 = shalt.err (!%p455_p13)
}
  0xed   : > { %373 = dma.vmem_to_hbm [thread:$0]  (%p575_p4), %s608_s18, 128, %s606_s23, %s262_s26   ;;  %v372_v11 = vpop.f32.mrf.mxu0 }
  0xee PF: > { %p379_p0 = scmp.ge.s32.totalorder %s509_s17, 2  ;;  %s288_s9 = sand.u32 1, %s489_s12  }
  0xef   : > { %s289_s10 = scalar_lea.sflag [#allocation4], %s288_s9 }
  0xf0   : > { %p376_p1 = pnand %p379_p0, %p582_p8 }
  0xf2   : > { %p377_p2 = pneg %p376_p1 }
  0xf4   : > { %484 = dma.done.wait (%p377_p2), %s289_s10, 128  }
  0xf5   : > { %486 = vsyncadd (%p377_p2), %s289_s10, 4294967168  ;;  %s16_s17 = sadd.s32 1, %s509_s17   ;;  %s658_s12 = smov %s493_s13 }
  0xf6   : > { %p13_p3 = scmp.ge.s32.totalorder %s16_s17, 4   ;;  %s659_s13 = smov %s497_s14 }
  0xf7   : > { %s660_s14 = smov %s588_s25  ;;  %s661_s15 = smov %s505_s16 }
  0xf8   : > { %s662_s16 = smov %s664_s20  ;;  %15 = sbr.rel (!%p13_p3) target bundleno = 4 (0x4), region = 67 }
  0xfd   :  { %294 = vsyncpa [#allocation4], 1 }
  0xfe   :  { %296 = vsyncpa [#allocation4 + $0x1], 1 }

</bundles_post_ra>
